<compile_context>
chip_gen: v6e
topology: v6e:2x2x1
jax: 0.10.0
libtpu: 0.0.40
codegen_flags: <defaults>
</compile_context>

<pallas_src>
import functools

import jax
import jax.numpy as jnp
from jax.experimental import pallas as pl
from jax.experimental.pallas import tpu as pltpu


def _atn_step_kernel(widx_ref, n_ref,                                   # scalar prefetch (SMEM)
                     x_ref, evict_ref, sum_ref, sumsq_ref, w_ref, b_ref,  # inputs
                     out_ref, ring_out_ref, nsum_ref, nsumsq_ref,         # outputs
                     *, eps):
    # x_ref: (Bb, S, F); evict_ref: (1, Bb, S, F) = ring slot being overwritten
    # sum_ref/sumsq_ref/nsum_ref/nsumsq_ref: (Bb, F); w_ref/b_ref: (1, F)
    x = x_ref[...]
    xf = x.astype(jnp.float32)
    evf = evict_ref[0].astype(jnp.float32)  # zeros during warm-up (ring starts zeroed)

    # Incremental sufficient statistics over (time, S) per (batch, feature).
    new_sum = sum_ref[...] + (jnp.sum(xf, axis=1) - jnp.sum(evf, axis=1))
    new_sumsq = sumsq_ref[...] + (jnp.sum(xf * xf, axis=1) - jnp.sum(evf * evf, axis=1))
    nsum_ref[...] = new_sum
    nsumsq_ref[...] = new_sumsq

    inv_n = 1.0 / n_ref[0].astype(jnp.float32)
    mean = new_sum * inv_n
    var = jnp.maximum(new_sumsq * inv_n - mean * mean, 0.0)  # guard cancellation drift
    inv_std = jax.lax.rsqrt(var + eps)

    # Fused affine: out = x * scale + shift (2 VALU ops per element).
    scale = w_ref[...] * inv_std                # (Bb, F)
    shift = b_ref[...] - mean * scale           # (Bb, F)
    out_ref[...] = (xf * scale[:, None, :] + shift[:, None, :]).astype(out_ref.dtype)

    # Write the new input into the ring slot (aliased output: in-place, rest of
    # the ring buffer in HBM is untouched).
    ring_out_ref[0] = x


def _pick_batch_block(B, S, F, dtype):
    """Largest divisor of B whose double-buffered tiles stay under ~8 MiB."""
    itemsize = max(jnp.dtype(dtype).itemsize, 4)
    budget = 8 * 1024 * 1024
    bb = B
    while bb > 1 and 8 * bb * S * F * itemsize > budget:
        nb = bb - 1
        while B % nb:
            nb -= 1
        bb = nb
    return bb


@functools.partial(jax.jit, static_argnames=("eps",), donate_argnums=(3, 4, 5))
def atn_step(widx, n, x, ring, sum_bf, sumsq_bf, w2, b2, *, eps):
    """One ATN step.

    widx: (1,) int32 ring slot to evict/overwrite.  n: (1,) int32 number of
    valid (time, S) elements.  x: (B,S,F) new input.  ring: (k,B,S,F) memory.
    sum_bf/sumsq_bf: (B,F) running stats.  w2/b2: (1,F) affine params.
    Returns (out, new_ring, new_sum, new_sumsq); ring/stat buffers are donated
    and updated in place via input_output_aliases.
    """
    k, B, S, F = ring.shape
    bb = _pick_batch_block(B, S, F, x.dtype)
    grid = (B // bb,)
    kernel = functools.partial(_atn_step_kernel, eps=float(eps))

    return pl.pallas_call(
        kernel,
        out_shape=(
            jax.ShapeDtypeStruct((B, S, F), x.dtype),       # normalized output
            jax.ShapeDtypeStruct(ring.shape, ring.dtype),    # updated ring (aliased)
            jax.ShapeDtypeStruct((B, F), jnp.float32),       # updated running sum (aliased)
            jax.ShapeDtypeStruct((B, F), jnp.float32),       # updated running sum^2 (aliased)
        ),
        grid_spec=pltpu.PrefetchScalarGridSpec(
            num_scalar_prefetch=2,
            grid=grid,
            in_specs=[
                pl.BlockSpec((bb, S, F), lambda b, widx, n: (b, 0, 0)),          # x
                pl.BlockSpec((1, bb, S, F), lambda b, widx, n: (widx[0], b, 0, 0)),  # evicted slot
                pl.BlockSpec((bb, F), lambda b, widx, n: (b, 0)),                # running sum
                pl.BlockSpec((bb, F), lambda b, widx, n: (b, 0)),                # running sum^2
                pl.BlockSpec((1, F), lambda b, widx, n: (0, 0)),                 # weight
                pl.BlockSpec((1, F), lambda b, widx, n: (0, 0)),                 # bias
            ],
            out_specs=[
                pl.BlockSpec((bb, S, F), lambda b, widx, n: (b, 0, 0)),          # out
                pl.BlockSpec((1, bb, S, F), lambda b, widx, n: (widx[0], b, 0, 0)),  # ring slot write
                pl.BlockSpec((bb, F), lambda b, widx, n: (b, 0)),                # new sum
                pl.BlockSpec((bb, F), lambda b, widx, n: (b, 0)),                # new sum^2
            ],
        ),
        # call-arg indices count the scalar-prefetch operands:
        #   0=widx, 1=n, 2=x, 3=ring, 4=sum, 5=sumsq, 6=w, 7=b
        input_output_aliases={3: 1, 4: 2, 5: 3},
        compiler_params=pltpu.CompilerParams(dimension_semantics=("parallel",)),
    )(widx, n, x, ring, sum_bf, sumsq_bf, w2, b2)


class ATN:
    """JAX/Pallas port of the stateful PyTorch ATN module (ring-buffer memory)."""

    def __init__(self, input_size, max_time=5, eps=1e-5):
        self.k = max_time
        self.eps = eps
        self.input_size = input_size
        # deterministic init matching the PyTorch module: weight=1, bias=0
        self.weight = jnp.ones((input_size,), jnp.float32)
        self.bias = jnp.zeros((input_size,), jnp.float32)
        self._w2 = self.weight.reshape(1, input_size)
        self._b2 = self.bias.reshape(1, input_size)
        self.reset_in_memory()

    def reset_in_memory(self):
        self.ring = None
        self.sum_bf = None
        self.sumsq_bf = None
        self.time_step = 0

    def __call__(self, new_input):
        B, S, F = new_input.shape
        if self.ring is None:
            # zero-initialized ring: "evicting" an unused slot subtracts zeros.
            self.ring = jnp.zeros((self.k, B, S, F), new_input.dtype)
            self.sum_bf = jnp.zeros((B, F), jnp.float32)
            self.sumsq_bf = jnp.zeros((B, F), jnp.float32)

        widx = jnp.array([self.time_step % self.k], jnp.int32)
        n = jnp.array([min(self.time_step + 1, self.k) * S], jnp.int32)

        out, self.ring, self.sum_bf, self.sumsq_bf = atn_step(
            widx, n, new_input, self.ring, self.sum_bf, self.sumsq_bf,
            self._w2, self._b2, eps=self.eps)
        self.time_step += 1
        return out


def _ref_forward(mem, x, w, b, eps):
    # plain-JAX reference of the torch forward (full recompute from memory)
    mean = jnp.mean(mem, axis=(0, 2), keepdims=True)   # (1, B, 1, F)
    var = jnp.var(mem, axis=(0, 2), keepdims=True)     # biased (unbiased=False)
    x_norm = (x - mean) * (var + eps) ** -0.5           # (1, B, S, F)
    return jnp.squeeze(x_norm * w + b)                  # (B, S, F)


if __name__ == "__main__":
    B, S, F = 2, 8, 32
    max_time = 3
    key = jax.random.PRNGKey(0)

    atn = ATN(input_size=F, max_time=max_time, eps=1e-5)
    ref_mem = []  # reference FIFO of raw inputs

    out = None
    for step in range(max_time + 2):  # exercise the eviction path twice
        key, sub = jax.random.split(key)
        x = jax.random.normal(sub, (B, S, F), dtype=jnp.float32)

        out = atn(x)

        # reference path: identical FIFO semantics, full recompute
        if len(ref_mem) >= max_time:
            ref_mem.pop(0)
        ref_mem.append(x)
        ref = _ref_forward(jnp.stack(ref_mem), x, atn.weight, atn.bias, atn.eps)

        out = jax.block_until_ready(out)
        assert out.shape == (B, S, F)
        err = float(jnp.max(jnp.abs(out - ref)))
        assert err < 1e-4, f"mismatch at step {step}: max err {err}"

    print("KERNEL_OK")
</pallas_src>

<mosaic_0001>
module attributes {stable_mosaic.version = 11 : i64} {
  func.func @_atn_step_kernel(%arg0: i32, %arg1: memref<1xi32, #tpu.memory_space<smem>>, %arg2: memref<1xi32, #tpu.memory_space<smem>>, %arg3: memref<2x8x32xf32, #tpu.memory_space<vmem>>, %arg4: memref<1x2x8x32xf32, #tpu.memory_space<vmem>>, %arg5: memref<2x32xf32, #tpu.memory_space<vmem>>, %arg6: memref<2x32xf32, #tpu.memory_space<vmem>>, %arg7: memref<1x32xf32, #tpu.memory_space<vmem>>, %arg8: memref<1x32xf32, #tpu.memory_space<vmem>>, %arg9: memref<2x8x32xf32, #tpu.memory_space<vmem>>, %arg10: memref<1x2x8x32xf32, #tpu.memory_space<vmem>>, %arg11: memref<2x32xf32, #tpu.memory_space<vmem>>, %arg12: memref<2x32xf32, #tpu.memory_space<vmem>>) attributes {dimension_semantics = [#tpu.dimension_semantics<parallel>], iteration_bounds = array<i64: 1>, scalar_prefetch = 2 : i64, scratch_operands = 0 : i64, tpu.core_type = #tpu.core_type<tc>, window_params = [{transform_indices = @transform_0, window_bounds = array<i64: 2, 8, 32>}, {transform_indices = @transform_1, window_bounds = array<i64: 1, 2, 8, 32>}, {transform_indices = @transform_2, window_bounds = array<i64: 2, 32>}, {transform_indices = @transform_3, window_bounds = array<i64: 2, 32>}, {pipeline_mode = #tpu.pipeline_mode<synchronous>, transform_indices = @transform_4, window_bounds = array<i64: 1, 32>}, {pipeline_mode = #tpu.pipeline_mode<synchronous>, transform_indices = @transform_5, window_bounds = array<i64: 1, 32>}, {transform_indices = @transform_6, window_bounds = array<i64: 2, 8, 32>}, {transform_indices = @transform_7, window_bounds = array<i64: 1, 2, 8, 32>}, {transform_indices = @transform_8, window_bounds = array<i64: 2, 32>}, {transform_indices = @transform_9, window_bounds = array<i64: 2, 32>}]} {
    %c0 = arith.constant 0 : index
    %c0_0 = arith.constant 0 : index
    %c0_1 = arith.constant 0 : index
    %0 = vector.load %arg3[%c0, %c0_0, %c0_1] : memref<2x8x32xf32, #tpu.memory_space<vmem>>, vector<2x8x32xf32>
    %c0_2 = arith.constant 0 : index
    %c0_3 = arith.constant 0 : index
    %c0_4 = arith.constant 0 : index
    %c0_5 = arith.constant 0 : index
    %1 = vector.load %arg4[%c0_2, %c0_3, %c0_4, %c0_5] : memref<1x2x8x32xf32, #tpu.memory_space<vmem>>, vector<1x2x8x32xf32>
    %2 = vector.shape_cast %1 : vector<1x2x8x32xf32> to vector<2x8x32xf32>
    %c0_6 = arith.constant 0 : index
    %c0_7 = arith.constant 0 : index
    %3 = vector.load %arg5[%c0_6, %c0_7] : memref<2x32xf32, #tpu.memory_space<vmem>>, vector<2x32xf32>
    %cst = arith.constant dense<0.000000e+00> : vector<2x32xf32>
    %4 = vector.multi_reduction <add>, %0, %cst [1] : vector<2x8x32xf32> to vector<2x32xf32>
    %cst_8 = arith.constant dense<0.000000e+00> : vector<2x32xf32>
    %5 = vector.multi_reduction <add>, %2, %cst_8 [1] : vector<2x8x32xf32> to vector<2x32xf32>
    %6 = arith.subf %4, %5 : vector<2x32xf32>
    %7 = arith.addf %3, %6 : vector<2x32xf32>
    %c0_9 = arith.constant 0 : index
    %c0_10 = arith.constant 0 : index
    %8 = vector.load %arg6[%c0_9, %c0_10] : memref<2x32xf32, #tpu.memory_space<vmem>>, vector<2x32xf32>
    %9 = arith.mulf %0, %0 : vector<2x8x32xf32>
    %cst_11 = arith.constant dense<0.000000e+00> : vector<2x32xf32>
    %10 = vector.multi_reduction <add>, %9, %cst_11 [1] : vector<2x8x32xf32> to vector<2x32xf32>
    %11 = arith.mulf %2, %2 : vector<2x8x32xf32>
    %cst_12 = arith.constant dense<0.000000e+00> : vector<2x32xf32>
    %12 = vector.multi_reduction <add>, %11, %cst_12 [1] : vector<2x8x32xf32> to vector<2x32xf32>
    %13 = arith.subf %10, %12 : vector<2x32xf32>
    %14 = arith.addf %8, %13 : vector<2x32xf32>
    %c0_13 = arith.constant 0 : index
    %c0_14 = arith.constant 0 : index
    %15 = vector.load %arg11[%c0_13, %c0_14] : memref<2x32xf32, #tpu.memory_space<vmem>>, vector<2x32xf32>
    tpu.vector_store %arg11[%c0_13, %c0_14], %7 {strides = array<i32>} : memref<2x32xf32, #tpu.memory_space<vmem>>, vector<2x32xf32>,
    %c0_15 = arith.constant 0 : index
    %c0_16 = arith.constant 0 : index
    %16 = vector.load %arg12[%c0_15, %c0_16] : memref<2x32xf32, #tpu.memory_space<vmem>>, vector<2x32xf32>
    tpu.vector_store %arg12[%c0_15, %c0_16], %14 {strides = array<i32>} : memref<2x32xf32, #tpu.memory_space<vmem>>, vector<2x32xf32>,
    %c0_17 = arith.constant 0 : index
    %17 = memref.load %arg2[%c0_17] : memref<1xi32, #tpu.memory_space<smem>>
    %18 = arith.sitofp %17 : i32 to f32
    %cst_18 = arith.constant 1.000000e+00 : f32
    %19 = arith.divf %cst_18, %18 : f32
    %20 = vector.broadcast %19 : f32 to vector<2x32xf32>
    %21 = arith.mulf %7, %20 : vector<2x32xf32>
    %22 = vector.broadcast %19 : f32 to vector<2x32xf32>
    %23 = arith.mulf %14, %22 : vector<2x32xf32>
    %24 = arith.mulf %21, %21 : vector<2x32xf32>
    %25 = arith.subf %23, %24 : vector<2x32xf32>
    %cst_19 = arith.constant 0.000000e+00 : f32
    %26 = vector.broadcast %cst_19 : f32 to vector<2x32xf32>
    %27 = arith.maximumf %25, %26 : vector<2x32xf32>
    %cst_20 = arith.constant 9.99999974E-6 : f32
    %28 = vector.broadcast %cst_20 : f32 to vector<2x32xf32>
    %29 = arith.addf %27, %28 : vector<2x32xf32>
    %30 = math.rsqrt %29 : vector<2x32xf32>
    %c0_21 = arith.constant 0 : index
    %c0_22 = arith.constant 0 : index
    %31 = vector.load %arg7[%c0_21, %c0_22] : memref<1x32xf32, #tpu.memory_space<vmem>>, vector<1x32xf32>
    %32 = vector.broadcast %31 : vector<1x32xf32> to vector<2x32xf32>
    %33 = arith.mulf %32, %30 : vector<2x32xf32>
    %c0_23 = arith.constant 0 : index
    %c0_24 = arith.constant 0 : index
    %34 = vector.load %arg8[%c0_23, %c0_24] : memref<1x32xf32, #tpu.memory_space<vmem>>, vector<1x32xf32>
    %35 = arith.mulf %21, %33 : vector<2x32xf32>
    %36 = vector.broadcast %34 : vector<1x32xf32> to vector<2x32xf32>
    %37 = arith.subf %36, %35 : vector<2x32xf32>
    %38 = vector.shape_cast %33 : vector<2x32xf32> to vector<2x1x32xf32>
    %39 = vector.broadcast %38 : vector<2x1x32xf32> to vector<2x8x32xf32>
    %40 = arith.mulf %0, %39 : vector<2x8x32xf32>
    %41 = vector.shape_cast %37 : vector<2x32xf32> to vector<2x1x32xf32>
    %42 = vector.broadcast %41 : vector<2x1x32xf32> to vector<2x8x32xf32>
    %43 = arith.addf %40, %42 : vector<2x8x32xf32>
    %c0_25 = arith.constant 0 : index
    %c0_26 = arith.constant 0 : index
    %c0_27 = arith.constant 0 : index
    %44 = vector.load %arg9[%c0_25, %c0_26, %c0_27] : memref<2x8x32xf32, #tpu.memory_space<vmem>>, vector<2x8x32xf32>
    tpu.vector_store %arg9[%c0_25, %c0_26, %c0_27], %43 {strides = array<i32>} : memref<2x8x32xf32, #tpu.memory_space<vmem>>, vector<2x8x32xf32>,
    %c0_28 = arith.constant 0 : index
    %c0_29 = arith.constant 0 : index
    %c0_30 = arith.constant 0 : index
    %c0_31 = arith.constant 0 : index
    %45 = vector.load %arg10[%c0_28, %c0_29, %c0_30, %c0_31] : memref<1x2x8x32xf32, #tpu.memory_space<vmem>>, vector<1x2x8x32xf32>
    %46 = vector.shape_cast %45 : vector<1x2x8x32xf32> to vector<2x8x32xf32>
    %47 = vector.shape_cast %0 : vector<2x8x32xf32> to vector<1x2x8x32xf32>
    tpu.vector_store %arg10[%c0_28, %c0_29, %c0_30, %c0_31], %47 {strides = array<i32>} : memref<1x2x8x32xf32, #tpu.memory_space<vmem>>, vector<1x2x8x32xf32>,
    return
  }
  func.func @transform_0(%arg0: i32, %arg1: memref<1xi32, #tpu.memory_space<smem>>, %arg2: memref<1xi32, #tpu.memory_space<smem>>) -> (i32, i32, i32) {
    %c0_i32 = arith.constant 0 : i32
    %c0_i32_0 = arith.constant 0 : i32
    %c0_i32_1 = arith.constant 0 : i32
    return %arg0, %c0_i32, %c0_i32_0 : i32, i32, i32
  }
  func.func @transform_1(%arg0: i32, %arg1: memref<1xi32, #tpu.memory_space<smem>>, %arg2: memref<1xi32, #tpu.memory_space<smem>>) -> (i32, i32, i32, i32) {
    %c0 = arith.constant 0 : index
    %0 = memref.load %arg1[%c0] : memref<1xi32, #tpu.memory_space<smem>>
    %c0_i32 = arith.constant 0 : i32
    %c0_i32_0 = arith.constant 0 : i32
    %c0_i32_1 = arith.constant 0 : i32
    return %0, %arg0, %c0_i32, %c0_i32_0 : i32, i32, i32, i32
  }
  func.func @transform_2(%arg0: i32, %arg1: memref<1xi32, #tpu.memory_space<smem>>, %arg2: memref<1xi32, #tpu.memory_space<smem>>) -> (i32, i32) {
    %c0_i32 = arith.constant 0 : i32
    %c0_i32_0 = arith.constant 0 : i32
    return %arg0, %c0_i32 : i32, i32
  }
  func.func @transform_3(%arg0: i32, %arg1: memref<1xi32, #tpu.memory_space<smem>>, %arg2: memref<1xi32, #tpu.memory_space<smem>>) -> (i32, i32) {
    %c0_i32 = arith.constant 0 : i32
    %c0_i32_0 = arith.constant 0 : i32
    return %arg0, %c0_i32 : i32, i32
  }
  func.func @transform_4(%arg0: i32, %arg1: memref<1xi32, #tpu.memory_space<smem>>, %arg2: memref<1xi32, #tpu.memory_space<smem>>) -> (i32, i32) {
    %c0_i32 = arith.constant 0 : i32
    %c0_i32_0 = arith.constant 0 : i32
    %c0_i32_1 = arith.constant 0 : i32
    return %c0_i32, %c0_i32_0 : i32, i32
  }
  func.func @transform_5(%arg0: i32, %arg1: memref<1xi32, #tpu.memory_space<smem>>, %arg2: memref<1xi32, #tpu.memory_space<smem>>) -> (i32, i32) {
    %c0_i32 = arith.constant 0 : i32
    %c0_i32_0 = arith.constant 0 : i32
    %c0_i32_1 = arith.constant 0 : i32
    return %c0_i32, %c0_i32_0 : i32, i32
  }
  func.func @transform_6(%arg0: i32, %arg1: memref<1xi32, #tpu.memory_space<smem>>, %arg2: memref<1xi32, #tpu.memory_space<smem>>) -> (i32, i32, i32) {
    %c0_i32 = arith.constant 0 : i32
    %c0_i32_0 = arith.constant 0 : i32
    %c0_i32_1 = arith.constant 0 : i32
    return %arg0, %c0_i32, %c0_i32_0 : i32, i32, i32
  }
  func.func @transform_7(%arg0: i32, %arg1: memref<1xi32, #tpu.memory_space<smem>>, %arg2: memref<1xi32, #tpu.memory_space<smem>>) -> (i32, i32, i32, i32) {
    %c0 = arith.constant 0 : index
    %0 = memref.load %arg1[%c0] : memref<1xi32, #tpu.memory_space<smem>>
    %c0_i32 = arith.constant 0 : i32
    %c0_i32_0 = arith.constant 0 : i32
    %c0_i32_1 = arith.constant 0 : i32
    return %0, %arg0, %c0_i32, %c0_i32_0 : i32, i32, i32, i32
  }
  func.func @transform_8(%arg0: i32, %arg1: memref<1xi32, #tpu.memory_space<smem>>, %arg2: memref<1xi32, #tpu.memory_space<smem>>) -> (i32, i32) {
    %c0_i32 = arith.constant 0 : i32
    %c0_i32_0 = arith.constant 0 : i32
    return %arg0, %c0_i32 : i32, i32
  }
  func.func @transform_9(%arg0: i32, %arg1: memref<1xi32, #tpu.memory_space<smem>>, %arg2: memref<1xi32, #tpu.memory_space<smem>>) -> (i32, i32) {
    %c0_i32 = arith.constant 0 : i32
    %c0_i32_0 = arith.constant 0 : i32
    return %arg0, %c0_i32 : i32, i32
  }
}

</mosaic_0001>

<bundles_post_ra>
// kernel: atn_step.1
= control target key start
LH: loop header
LB: loop body
LE: loop exit
PB: predicated region body
PF: predicated region fallthrough
CT: control target
= control target key end

     0   :  { %19 = vsyncpa [#allocation6], 0  ;;  %s733_s0 = inlined_call_operand.<no memory space> [shape: s32[1], index: 0, kind: input, shape index: {}]   ;;  %s734_s1 = inlined_call_operand.<no memory space> [shape: s32[1], index: 1, kind: input, shape index: {}]   ;;  %s735_s2 = inlined_call_operand.hbm [shape: f32[2,8,32], index: 2, kind: input, shape index: {}]   ;;  %s736_s3 = inlined_call_operand.hbm [shape: f32[3,2,8,32], index: 3, kind: input, shape index: {}, may-alias: {3,9}]   ;;  %s737_s4 = inlined_call_operand.hbm [shape: f32[2,32], index: 4, kind: input, shape index: {}, may-alias: {4,10}]   ;;  %s738_s5 = inlined_call_operand.hbm [shape: f32[2,32], index: 5, kind: input, shape index: {}, may-alias: {5,11}]   ;;  %s739_s6 = inlined_call_operand.vmem [shape: f32[1,32], index: 6, kind: input, shape index: {}]   ;;  %s740_s7 = inlined_call_operand.vmem [shape: f32[1,32], index: 7, kind: input, shape index: {}]   ;;  %s741_s8 = inlined_call_operand.hbm [shape: f32[2,8,32], index: 8, kind: output, shape index: {0}]   ;;  %s742_s9 = inlined_call_operand.hbm [shape: f32[3,2,8,32], index: 9, kind: output, shape index: {1}, may-alias: {3,9}]   ;;  %s743_s10 = inlined_call_operand.hbm [shape: f32[2,32], index: 10, kind: output, shape index: {2}, may-alias: {4,10}]   ;;  %s744_s11 = inlined_call_operand.hbm [shape: f32[2,32], index: 11, kind: output, shape index: {3}, may-alias: {5,11}]  }
   0x1   :  { %20 = vsyncpa [#allocation9], 0 }
   0x2   :  { %21 = vsyncpa [#allocation12], 0 }
   0x3   :  { %22 = vsyncpa [#allocation7], 0 }
   0x4   :  { %23 = vsyncpa [#allocation15], 0 }
   0x5   :  { %24 = vsyncpa [#allocation18], 0  ;;  %s356_s19 = sshll.u32 %s733_s0, 8  ;;  %s551_s25 = smov [#allocation8]  }
   0x6   :  { %s45_s24 = scalar_lea.hbm %s736_s3, %s356_s19  ;;  %s46_s26 = sshll.u32 %s551_s25, 4  ;;  %s47_s26 = int_to_ptr.vmem [resolvable:$true] %s46_s26 }
   0x7   :  { %s375_s27 = scalar_lea.hbm %s45_s24, 256  ;;  %s377_s30 = scalar_lea.hbm %s736_s3, 768 }
   0x8   :  { %p376_p0 = scmp.ne.s32.totalorder %s45_s24, %s375_s27  ;;  %p378_p1 = scmp.lt.s32.totalorder %s45_s24, %s736_s3 }
   0x9   :  { %p379_p2 = scmp.lt.s32.totalorder %s377_s30, %s375_s27 }
   0xb   :  { %p380_p3 = por %p379_p2, %p378_p1 }
   0xd   :  { %p381_p4 = pnand %p380_p3, %p376_p0 }
   0xf   :  { %384 = shalt.err (!%p381_p4)
}
  0x10   :  { %s385_s14 = scalar_lea.vmem %s47_s26, 256  ;;  %p390_p6 = scmp.lt.s32.totalorder %s47_s26, %s47_s26 }
  0x11   :  { %p386_p5 = scmp.ne.s32.totalorder %s47_s26, %s385_s14  ;;  %p391_p7 = scmp.lt.s32.totalorder %s385_s14, %s385_s14 }
  0x13   :  { %p392_p8 = por %p391_p7, %p390_p6 }
  0x15   :  { %p393_p9 = pnand %p392_p8, %p386_p5 }
  0x17   :  { %396 = shalt.err (!%p393_p9)
}
  0x18   :  { %s552_s15 = smov 128   ;;  %s553_s16 = smov 8  }
  0x19   :  { %52 = dma.hbm_to_vmem [thread:$0]  %s45_s24, 256, %s47_s26, [#allocation9], %s552_s15, %s552_s15, %s553_s16  }
  0x1a   :  { %s554_s17 = smov [#allocation5]   ;;  %s555_s3 = smov [#allocation10]  }
  0x1b   :  { %s30_s18 = sshll.u32 %s554_s17, 4  ;;  %s59_s20 = sshll.u32 %s555_s3, 4  ;;  %s31_s18 = int_to_ptr.vmem [resolvable:$true] %s30_s18  ;;  %s60_s20 = int_to_ptr.vmem [resolvable:$true] %s59_s20 }
  0x1c   :  { %s405_s21 = scalar_lea.vmem %s31_s18, 256  ;;  %p410_p11 = scmp.lt.s32.totalorder %s31_s18, %s31_s18 }
  0x1d   :  { %p406_p10 = scmp.ne.s32.totalorder %s31_s18, %s405_s21  ;;  %p411_p12 = scmp.lt.s32.totalorder %s405_s21, %s405_s21 }
  0x1f   :  { %p412_p13 = por %p411_p12, %p410_p11 }
  0x21   :  { %p413_p0 = pnand %p412_p13, %p406_p10 }
  0x23   :  { %416 = shalt.err (!%p413_p0)
}
  0x24   :  { %36 = dma.hbm_to_vmem [thread:$0]  %s735_s2, 256, %s31_s18, [#allocation6], %s552_s15, %s552_s15, %s553_s16  }
  0x25   :  { %s425_s24 = scalar_lea.vmem %s60_s20, 32  ;;  %p430_p2 = scmp.lt.s32.totalorder %s60_s20, %s60_s20 }
  0x26   :  { %p426_p1 = scmp.ne.s32.totalorder %s60_s20, %s425_s24  ;;  %p431_p3 = scmp.lt.s32.totalorder %s425_s24, %s425_s24 }
  0x28   :  { %p432_p4 = por %p431_p3, %p430_p2 }
  0x2a   :  { %p433_p5 = pnand %p432_p4, %p426_p1 }
  0x2c   :  { %436 = shalt.err (!%p433_p5)
}
  0x2d   :  { %62 = dma.hbm_to_vmem [thread:$0]  %s737_s4, 32, %s60_s20, [#allocation9]  }
  0x2e   :  { %s556_s27 = smov [#allocation11]  }
  0x2f   :  { %s69_s28 = sshll.u32 %s556_s27, 4  ;;  %s70_s28 = int_to_ptr.vmem [resolvable:$true] %s69_s28 }
  0x30   :  { %s445_s29 = scalar_lea.vmem %s70_s28, 32  ;;  %p450_p7 = scmp.lt.s32.totalorder %s70_s28, %s70_s28 }
  0x31   :  { %p446_p6 = scmp.ne.s32.totalorder %s70_s28, %s445_s29  ;;  %p451_p8 = scmp.lt.s32.totalorder %s445_s29, %s445_s29 }
  0x33   :  { %p452_p9 = por %p451_p8, %p450_p7 }
  0x35   :  { %p453_p10 = pnand %p452_p9, %p446_p6 }
  0x37   :  { %456 = shalt.err (!%p453_p10)
}
  0x38   :  { %72 = dma.hbm_to_vmem [thread:$0]  %s738_s5, 32, %s70_s28, [#allocation12]  }
  0x39   :  { %539 = dma.done.wait [#allocation6], 256  }
  0x3a   :  { %540 = vsyncadd [#allocation6], 4294967040 }
  0x3b   :  { %541 = dma.done.wait [#allocation9], 288  }
  0x3c   :  { %542 = vsyncadd [#allocation9], 4294967008  ;;  %s177_s13 = scvt.s32.f32 %s734_s1 }
  0x3d   :  { %543 = dma.done.wait [#allocation12], 32  }
  0x3e   :  { %544 = vsyncadd [#allocation12], 4294967264  ;;  %v178_v0 = vstv %s177_s13  ;;  %vm96_vm0 = vcmask 261120   ;;  %s557_s14 = smov [#allocation14]   ;;  %v656_v1 = vld [vmem:[#allocation5] sm:$0xff]  ;;  %v658_v2 = vld [vmem:[#allocation5 + $0x8] sm:$0xff]  ;;  %s678_s20 = scalar_lea.hbm %s742_s9, %s356_s19 }
  0x3f   :  { %371 = vrcp.f32 %v178_v0  ;;  %s301_s17 = sshll.u32 %s557_s14, 4  ;;  %v93_v3 = vld [vmem:[#allocation8] sm:$0xff]  ;;  %v94_v4 = vld [vmem:[#allocation8 + $0x8] sm:$0xff]  ;;  %v97_v5 = vsel %vm96_vm0, %v656_v1, 0.0  ;;  %v104_v6 = vsel %vm96_vm0, %v658_v2, 0.0  ;;  %v134_v8 = vmul.f32 %v656_v1, %v656_v1  ;;  %278 = vst.msk [vmem:[#allocation14] sm:$0xff] %vm96_vm0, %v656_v1  ;;  %s680_s17 = int_to_ptr.vmem [resolvable:$true] %s301_s17 }
  0x40   :  { %v111_v7 = vsel %vm96_vm0, %v93_v3, 0.0  ;;  %279 = vst.msk [vmem:[#allocation14 + $0x8] sm:$0xff] %vm96_vm0, %v658_v2  ;;  %v98_v9 = vrot.slane %v97_v5, 4  ;;  %v105_v10 = vrot.slane %v104_v6, 4  ;;  %v118_v12 = vsel %vm96_vm0, %v94_v4, 0.0  ;;  %s457_s0 = scalar_lea.vmem %s680_s17, 256  ;;  %p462_p12 = scmp.lt.s32.totalorder %s680_s17, %s680_s17 }
  0x41   :  { %v112_v11 = vrot.slane %v111_v7, 4  ;;  %v119_v13 = vrot.slane %v118_v12, 4  ;;  %v135_v14 = vmul.f32 %v658_v2, %v658_v2  ;;  %v136_v15 = vsel %vm96_vm0, %v134_v8, 0.0  ;;  %p458_p11 = scmp.ne.s32.totalorder %s680_s17, %s457_s0  ;;  %p463_p13 = scmp.lt.s32.totalorder %s457_s0, %s457_s0 }
  0x42   :  { %v150_v16 = vmul.f32 %v93_v3, %v93_v3  ;;  %v99_v17 = vadd.f32 %v98_v9, %v97_v5  ;;  %v106_v18 = vadd.f32 %v105_v10, %v104_v6  ;;  %v137_v20 = vrot.slane %v136_v15, 4 }
  0x43   :  { %v113_v19 = vadd.f32 %v112_v11, %v111_v7  ;;  %p464_p0 = por %p463_p13, %p462_p12 }
  0x45   :  { %p465_p1 = pnand %p464_p0, %p458_p11 }
  0x47   :  { %468 = shalt.err (!%p465_p1)
}
  0x48   :  { %s469_s19 = scalar_lea.hbm %s678_s20, 256  ;;  %s471_s23 = scalar_lea.hbm %s742_s9, 768 }
  0x49   :  { %p470_p2 = scmp.ne.s32.totalorder %s678_s20, %s469_s19  ;;  %p472_p3 = scmp.lt.s32.totalorder %s678_s20, %s742_s9 }
  0x4a   :  { %p473_p4 = scmp.lt.s32.totalorder %s471_s23, %s469_s19 }
  0x4c   :  { %p474_p5 = por %p473_p4, %p472_p3 }
  0x4e   :  { %p475_p6 = pnand %p474_p5, %p470_p2 }
  0x50   :  { %478 = shalt.err (!%p475_p6)
}
  0x51   :  { %307 = dma.vmem_to_hbm [thread:$0]  %s680_s17, 256, %s678_s20, [#allocation15], %s552_s15, %s552_s15, %s553_s16   ;;  %v120_v21 = vadd.f32 %v119_v13, %v118_v12  ;;  %v143_v22 = vsel %vm96_vm0, %v135_v14, 0.0  ;;  %v151_v23 = vmul.f32 %v94_v4, %v94_v4  ;;  %v152_v24 = vsel %vm96_vm0, %v150_v16, 0.0  ;;  %v372_v37 = vpop.eup %371  ;;  %v95_v60 = vld [vmem:[#allocation10] sm:$0x3] }
  0x52   :  { %v100_v25 = vrot.slane %v99_v17, 2  ;;  %v107_v26 = vrot.slane %v106_v18, 2  ;;  %v114_v27 = vrot.slane %v113_v19, 2  ;;  %v138_v28 = vadd.f32 %v137_v20, %v136_v15  ;;  %358 = vpush %v372_v37  ;;  %s558_s9 = smov [#allocation16]   ;;  %s559_s27 = smov [#allocation17]  }
  0x53   :  { %v121_v29 = vrot.slane %v120_v21, 2  ;;  %v144_v30 = vrot.slane %v143_v22, 4  ;;  %v153_v31 = vrot.slane %v152_v24, 4  ;;  %v159_v32 = vsel %vm96_vm0, %v151_v23, 0.0  ;;  %s314_s26 = sshll.u32 %s558_s9, 4  ;;  %s324_s28 = sshll.u32 %s559_s27, 4  ;;  %s315_s26 = int_to_ptr.vmem [resolvable:$true] %s314_s26  ;;  %s325_s28 = int_to_ptr.vmem [resolvable:$true] %s324_s28 }
  0x54   :  { %v101_v33 = vadd.f32 %v100_v25, %v99_v17  ;;  %v108_v34 = vadd.f32 %v107_v26, %v106_v18  ;;  %v115_v35 = vadd.f32 %v114_v27, %v113_v19  ;;  %v139_v36 = vrot.slane %v138_v28, 2  ;;  %v133_v10 = vld [vmem:[#allocation11] sm:$0x3]  ;;  %s479_s29 = scalar_lea.vmem %s315_s26, 32  ;;  %p484_p8 = scmp.lt.s32.totalorder %s315_s26, %s315_s26 }
  0x55   :  { %v122_v38 = vadd.f32 %v121_v29, %v120_v21  ;;  %v145_v39 = vadd.f32 %v144_v30, %v143_v22  ;;  %v154_v40 = vadd.f32 %v153_v31, %v152_v24  ;;  %v160_v41 = vrot.slane %v159_v32, 4  ;;  %p480_p7 = scmp.ne.s32.totalorder %s315_s26, %s479_s29  ;;  %p485_p9 = scmp.lt.s32.totalorder %s479_s29, %s479_s29 }
  0x56   :  { %v102_v42 = vrot.slane %v101_v33, 1  ;;  %v109_v43 = vrot.slane %v108_v34, 1  ;;  %v116_v44 = vrot.slane %v115_v35, 1  ;;  %v140_v45 = vadd.f32 %v139_v36, %v138_v28 }
  0x57   :  { %v123_v46 = vrot.slane %v122_v38, 1  ;;  %v146_v47 = vrot.slane %v145_v39, 2  ;;  %v155_v48 = vrot.slane %v154_v40, 2  ;;  %v161_v49 = vadd.f32 %v160_v41, %v159_v32  ;;  %p486_p10 = por %p485_p9, %p484_p8 }
  0x58   :  { %v103_v50 = vadd.f32 %v102_v42, %v101_v33  ;;  %v110_v51 = vadd.f32 %v109_v43, %v108_v34  ;;  %v117_v52 = vadd.f32 %v116_v44, %v115_v35  ;;  %v141_v53 = vrot.slane %v140_v45, 1 }
  0x59   :  { %v124_v54 = vadd.f32 %v123_v46, %v122_v38  ;;  %v147_v55 = vadd.f32 %v146_v47, %v145_v39  ;;  %v156_v56 = vadd.f32 %v155_v48, %v154_v40  ;;  %v162_v57 = vrot.slane %v161_v49, 2  ;;  %p487_p11 = pnand %p486_p10, %p480_p7 }
  0x5a   :  { %v125_v58 = vsub.f32 %v103_v50, %v117_v52  ;;  %vm129_vm1 = vcmask 1041409   ;;  %v142_v59 = vadd.f32 %v141_v53, %v140_v45  ;;  %vm173_vm2 = vcmask 254976  }
  0x5b   :  { %v126_v61 = vsub.f32 %v110_v51, %v124_v54  ;;  %v148_v62 = vrot.slane %v147_v55, 1  ;;  %v157_v63 = vrot.slane %v156_v56, 1  ;;  %v163_v0 = vadd.f32 %v162_v57, %v161_v49 }
  0x5d   :  { %v130_v3 = vsel %vm129_vm1, %v126_v61, %v125_v58  ;;  %v149_v4 = vadd.f32 %v148_v62, %v147_v55  ;;  %v158_v5 = vadd.f32 %v157_v63, %v156_v56  ;;  %v164_v6 = vrot.slane %v163_v0, 1 }
  0x5e   :  { %v132_v7 = vadd.f32 %v130_v3, %v95_v60 }
  0x5f   :  { %v165_v8 = vadd.f32 %v164_v6, %v163_v0  ;;  %v166_v9 = vsub.f32 %v142_v59, %v158_v5 }
  0x60   :  { %174 = vst.msk [vmem:[#allocation16] sm:$0x3] %vm173_vm2, %v132_v7 }
  0x61   :  { %v167_v11 = vsub.f32 %v149_v4, %v165_v8 }
  0x62   :  { %490 = shalt.err (!%p487_p11)
}
  0x63   :  { %317 = dma.vmem_to_hbm [thread:$0]  %s315_s26, 32, %s743_s10, [#allocation15]   ;;  %v170_v12 = vsel %vm129_vm1, %v167_v11, %v166_v9 }
  0x64   :  { %v172_v13 = vadd.f32 %v170_v12, %v133_v10  ;;  %s499_s12 = scalar_lea.vmem %s325_s28, 32  ;;  %p504_p13 = scmp.lt.s32.totalorder %s325_s28, %s325_s28 }
  0x65   :  { %p500_p12 = scmp.ne.s32.totalorder %s325_s28, %s499_s12  ;;  %p505_p0 = scmp.lt.s32.totalorder %s499_s12, %s499_s12 }
  0x66   :  { %175 = vst.msk [vmem:[#allocation17] sm:$0x3] %vm173_vm2, %v172_v13 }
  0x67   :  { %p506_p1 = por %p505_p0, %p504_p13 }
  0x69   :  { %p507_p2 = pnand %p506_p1, %p500_p12 }
  0x6b   :  { %510 = shalt.err (!%p507_p2)
}
  0x6c   :  { %327 = dma.vmem_to_hbm [thread:$0]  %s325_s28, 32, %s744_s11, [#allocation18]   ;;  %v560_v21 = vmov 1966171168   ;;  %v210_v23 = vlaneseq  ;;  %v352_v26 = vld [vmem:[%s739_s6] ss:$0 sm:$0xff] }
  0x6d   :  { %v208_v22 = vunpack.c.l.s4 %v560_v21  ;;  %v353_v30 = vld [vmem:[%s740_s7] ss:$0 sm:$0xff]  ;;  %s561_s6 = smov [#allocation13]  }
  0x6e   :  { %v211_v25 = vshrl.u32 %v210_v23, 7  ;;  %s285_s5 = sshll.u32 %s561_s6, 4  ;;  %s286_s5 = int_to_ptr.vmem [resolvable:$true] %s285_s5 }
  0x6f   :  { %v209_v24 = vunpack.c.0.s8 %v208_v22  ;;  %s519_s7 = scalar_lea.vmem %s286_s5, 256  ;;  %p524_p4 = scmp.lt.s32.totalorder %s286_s5, %s286_s5 }
  0x70   :  { %v231_v33 = vsub.s32 0, %v211_v25  ;;  %p520_p3 = scmp.ne.s32.totalorder %s286_s5, %s519_s7  ;;  %p525_p5 = scmp.lt.s32.totalorder %s519_s7, %s519_s7 }
  0x71   :  { %v212_v27 = vsub.s32 %v209_v24, %v211_v25 }
  0x72   :  { %p526_p6 = por %p525_p5, %p524_p4 }
  0x74   :  { %p527_p7 = pnand %p526_p6, %p520_p3 }
  0x83   :  { %s359_s14 = spop %358 }
  0x84   :  { %v181_v14 = vstv %s359_s14 }
  0x85   :  { %v182_v15 = vmul.f32 %v181_v14, %v132_v7  ;;  %v183_v16 = vmul.f32 %v181_v14, %v172_v13 }
  0x87   :  { %v184_v17 = vmul.f32 %v182_v15, %v182_v15 }
  0x89   :  { %v185_v18 = vsub.f32 %v183_v16, %v184_v17 }
  0x8b   :  { %v186_v19 = vmax.f32 %v185_v18, 0.0 }
  0x8d   :  { %v187_v20 = vadd.f32 1e-05, %v186_v19 }
  0x8f   :  { %373 = vrsqrt.f32 %v187_v20 }
  0x9c   :  { %v374_v28 = vpop.eup %373 }
  0x9d   :  { %v196_v29 = vmul.f32 %v374_v28, %v352_v26 }
  0x9f   :  { %v198_v31 = vmul.f32 %v196_v29, %v182_v15  ;;  %v213_v32 = vrot.slane %v196_v29, %v212_v27 }
  0xa1   :  { %v205_v34 = vsub.f32 %v353_v30, %v198_v31  ;;  %v214_v35 = vcombine.high %v213_v32, %v213_v32  ;;  %v221_v36 = vrot.slane %v213_v32, %v212_v27 }
  0xa3   :  { %v228_v37 = vrot.slane %v214_v35, %v212_v27  ;;  %v232_v38 = vrot.slane %v221_v36, %v231_v33  ;;  %v248_v39 = vrot.slane %v205_v34, %v212_v27 }
  0xa5   :  { %v249_v40 = vcombine.high %v248_v39, %v248_v39  ;;  %v256_v41 = vrot.slane %v248_v39, %v212_v27  ;;  %v236_v42 = vrot.slane %v228_v37, %v231_v33  ;;  %v239_v44 = vmul.f32 %v232_v38, %v656_v1 }
  0xa7   :  { %v263_v43 = vrot.slane %v249_v40, %v212_v27  ;;  %v267_v45 = vrot.slane %v256_v41, %v231_v33  ;;  %v240_v46 = vmul.f32 %v236_v42, %v658_v2 }
  0xa9   :  { %v271_v47 = vrot.slane %v263_v43, %v231_v33  ;;  %v274_v48 = vadd.f32 %v267_v45, %v239_v44 }
  0xab   :  { %v275_v49 = vadd.f32 %v271_v47, %v240_v46  ;;  %276 = vst.msk [vmem:[#allocation13] sm:$0xff] %vm96_vm0, %v274_v48 }
  0xad   :  { %277 = vst.msk [vmem:[#allocation13 + $0x8] sm:$0xff] %vm96_vm0, %v275_v49 }
  0xae   :  { %530 = shalt.err (!%p527_p7)
}
  0xaf   :  { %291 = dma.vmem_to_hbm [thread:$0]  %s286_s5, 256, %s741_s8, [#allocation7], %s552_s15, %s552_s15, %s553_s16  }
  0xb0   :  { %545 = dma.done.wait [#allocation7], 256  }
  0xb1   :  { %546 = vsyncadd [#allocation7], 4294967040 }
  0xb2   :  { %547 = dma.done.wait [#allocation15], 288  }
  0xb3   :  { %548 = vsyncadd [#allocation15], 4294967008 }
  0xb4   :  { %549 = dma.done.wait [#allocation18], 32  }
  0xb5   :  { %550 = vsyncadd [#allocation18], 4294967264 }
  0xb6   :  { %340 = vsyncpa [#allocation6], 1 }
  0xb7   :  { %341 = vsyncpa [#allocation9], 1 }
  0xb8   :  { %342 = vsyncpa [#allocation12], 1 }
  0xb9   :  { %343 = vsyncpa [#allocation7], 1 }
  0xba   :  { %344 = vsyncpa [#allocation15], 1 }
  0xbb   :  { %345 = vsyncpa [#allocation18], 1 }

</bundles_post_ra>
